<compile_context>
chip_gen: v6e
topology: v6e:2x2x1
jax: 0.10.0
libtpu: 0.0.40
codegen_flags: <defaults>
</compile_context>

<pallas_src>
import jax
import jax.numpy as jnp
from jax import lax
from jax.experimental import pallas as pl
from jax.experimental.pallas import tpu as pltpu


def _patch_embed_kernel(patches_ref, w_ref, b_ref, o_ref):
    # patches_ref: (TM, K) bf16  rows = flattened patches (B*N on sublanes)
    # w_ref:       (K, E)  bf16  flattened conv weight (transposed, resident)
    # b_ref:       (1, E)  f32   conv bias (resident)
    # o_ref:       (TM, E)       lane-dense output tile
    acc = jnp.dot(
        patches_ref[...], w_ref[...],
        preferred_element_type=jnp.float32,   # native bf16 MXU, f32 accumulate
    )
    o_ref[...] = (acc + b_ref[...]).astype(o_ref.dtype)


def _round_up(a, b):
    return (a + b - 1) // b * b


def patch_embeddings(x, weight, bias, patch_size, *, out_dtype=None):
    """x: (B, C, H, W).  weight: (E, C, P, P) conv kernel.  bias: (E,).

    Returns (B, N, E) with N = (H//P) * (W//P), matching
    Conv2d(k=P, s=P) -> Flatten(2, 3) -> permute(0, 2, 1).
    """
    B, C, H, W = x.shape
    E = weight.shape[0]
    P = patch_size
    nh, nw = H // P, W // P
    N = nh * nw
    K = C * P * P
    M = B * N
    out_dtype = x.dtype if out_dtype is None else out_dtype

    # im2col (pure layout): (B,C,nh,P,nw,P) -> (B,nh,nw,C,P,P) -> (B*N, C*P*P).
    # Row order b*N + ih*nw + iw and (c, kh, kw) column flattening match the
    # conv / flatten / permute ordering of the PyTorch module.  Cast to bf16
    # so the MXU runs native bf16 and the patch matrix carries half the bytes.
    patches = x.reshape(B, C, nh, P, nw, P).transpose(0, 2, 4, 1, 3, 5)
    patches = patches.reshape(M, K).astype(jnp.bfloat16)
    w = weight.reshape(E, K).T.astype(jnp.bfloat16)     # (K, E)
    b = bias.astype(jnp.float32).reshape(1, E)

    # Row tiling: single step only for tiny M; otherwise >=2 grid steps so the
    # v7x megacore can shard the "parallel" row axis, with tiles up to 512
    # rows (big tiles approach the HBM streaming roofline).
    ROW_ALIGN = 16                      # bf16 sublane packing
    if M <= ROW_ALIGN:
        TM = M
    else:
        TM = min(512, _round_up(pl.cdiv(M, 2), ROW_ALIGN))
    grid = (pl.cdiv(M, TM),)

    out = pl.pallas_call(
        _patch_embed_kernel,
        out_shape=jax.ShapeDtypeStruct((M, E), out_dtype),
        grid=grid,
        in_specs=[
            pl.BlockSpec((TM, K), lambda i: (i, 0)),   # patch rows (pipelined)
            pl.BlockSpec((K, E), lambda i: (0, 0)),    # weight (resident)
            pl.BlockSpec((1, E), lambda i: (0, 0)),    # bias   (resident)
        ],
        out_specs=pl.BlockSpec((TM, E), lambda i: (i, 0)),
        compiler_params=pltpu.CompilerParams(
            dimension_semantics=("parallel",),
            vmem_limit_bytes=32 * 1024 * 1024,
            # Let XLA fuse the im2col reshape/transpose producer into the
            # kernel input instead of a separate HBM round-trip.
            allow_input_fusion=[True, False, False],
        ),
    )(patches, w, b)

    return out.reshape(B, N, E)


def _reference(x, weight, bias, patch_size):
    """Pure-JAX full-precision reference mirroring the PyTorch forward."""
    out = lax.conv_general_dilated(
        x, weight,
        window_strides=(patch_size, patch_size),
        padding="VALID",
        dimension_numbers=("NCHW", "OIHW", "NCHW"),
        precision=lax.Precision.HIGHEST,
    )
    out = out + bias[None, :, None, None]
    B, E, nh, nw = out.shape
    return out.reshape(B, E, nh * nw).transpose(0, 2, 1)


if __name__ == "__main__":
    # Small shapes consistent with the module: batch=2, in_channels=3,
    # 32x32 image, patch_size=16 (-> 4 patches), embedding_dim=256
    # (multiple of 128 for lane-dense output).
    B, C, H, W = 2, 3, 32, 32
    P, E = 16, 256

    key = jax.random.PRNGKey(0)
    kx, kw, kb = jax.random.split(key, 3)

    x = jax.random.normal(kx, (B, C, H, W), dtype=jnp.float32)

    # Conv2d-style init: uniform(-1/sqrt(fan_in), 1/sqrt(fan_in)).
    fan_in = C * P * P
    bound = 1.0 / (fan_in ** 0.5)
    weight = jax.random.uniform(kw, (E, C, P, P), jnp.float32, -bound, bound)
    bias = jax.random.uniform(kb, (E,), jnp.float32, -bound, bound)

    fn = jax.jit(lambda xx, ww, bb: patch_embeddings(xx, ww, bb, P))
    out = jax.block_until_ready(fn(x, weight, bias))

    ref = _reference(x, weight, bias, P)
    N = (H // P) * (W // P)
    assert out.shape == (B, N, E), out.shape
    # bf16-matmul tolerance against the f32 HIGHEST conv reference.
    assert jnp.allclose(out, ref, atol=2e-2, rtol=2e-2), (
        float(jnp.max(jnp.abs(out - ref))))

    print("KERNEL_OK")
</pallas_src>

<mosaic_0001>
module attributes {stable_mosaic.version = 11 : i64} {
  func.func @_patch_embed_kernel(%arg0: i32, %arg1: memref<8x768xbf16, #tpu.memory_space<vmem>>, %arg2: memref<768x256xbf16, #tpu.memory_space<vmem>>, %arg3: memref<1x256xf32, #tpu.memory_space<vmem>>, %arg4: memref<8x256xf32, #tpu.memory_space<vmem>>) attributes {dimension_semantics = [#tpu.dimension_semantics<parallel>], iteration_bounds = array<i64: 1>, scalar_prefetch = 0 : i64, scratch_operands = 0 : i64, tpu.core_type = #tpu.core_type<tc>, window_params = [{transform_indices = @transform_0, window_bounds = array<i64: 8, 768>}, {pipeline_mode = #tpu.pipeline_mode<synchronous>, transform_indices = @transform_1, window_bounds = array<i64: 768, 256>}, {pipeline_mode = #tpu.pipeline_mode<synchronous>, transform_indices = @transform_2, window_bounds = array<i64: 1, 256>}, {transform_indices = @transform_3, window_bounds = array<i64: 8, 256>}]} {
    %c0 = arith.constant 0 : index
    %c0_0 = arith.constant 0 : index
    %0 = vector.load %arg1[%c0, %c0_0] : memref<8x768xbf16, #tpu.memory_space<vmem>>, vector<8x768xbf16>
    %c0_1 = arith.constant 0 : index
    %c0_2 = arith.constant 0 : index
    %1 = vector.load %arg2[%c0_1, %c0_2] : memref<768x256xbf16, #tpu.memory_space<vmem>>, vector<768x256xbf16>
    %cst = arith.constant dense<0.000000e+00> : vector<8x256xf32>
    %2 = tpu.matmul %0, %1, %cst {dimension_numbers = #tpu.dot_dimension_numbers<[1], [0], [0], [1], [0, 0, 1, 1], [], []>} : vector<8x768xbf16>, vector<768x256xbf16>, vector<8x256xf32> -> vector<8x256xf32>
    %c0_3 = arith.constant 0 : index
    %c0_4 = arith.constant 0 : index
    %3 = vector.load %arg3[%c0_3, %c0_4] : memref<1x256xf32, #tpu.memory_space<vmem>>, vector<1x256xf32>
    %4 = vector.broadcast %3 : vector<1x256xf32> to vector<8x256xf32>
    %5 = arith.addf %2, %4 : vector<8x256xf32>
    %c0_5 = arith.constant 0 : index
    %c0_6 = arith.constant 0 : index
    %6 = vector.load %arg4[%c0_5, %c0_6] : memref<8x256xf32, #tpu.memory_space<vmem>>, vector<8x256xf32>
    tpu.vector_store %arg4[%c0_5, %c0_6], %5 {strides = array<i32>} : memref<8x256xf32, #tpu.memory_space<vmem>>, vector<8x256xf32>,
    return
  }
  func.func @transform_0(%arg0: i32) -> (i32, i32) {
    %c0_i32 = arith.constant 0 : i32
    %c0_i32_0 = arith.constant 0 : i32
    return %arg0, %c0_i32 : i32, i32
  }
  func.func @transform_1(%arg0: i32) -> (i32, i32) {
    %c0_i32 = arith.constant 0 : i32
    %c0_i32_0 = arith.constant 0 : i32
    %c0_i32_1 = arith.constant 0 : i32
    return %c0_i32, %c0_i32_0 : i32, i32
  }
  func.func @transform_2(%arg0: i32) -> (i32, i32) {
    %c0_i32 = arith.constant 0 : i32
    %c0_i32_0 = arith.constant 0 : i32
    %c0_i32_1 = arith.constant 0 : i32
    return %c0_i32, %c0_i32_0 : i32, i32
  }
  func.func @transform_3(%arg0: i32) -> (i32, i32) {
    %c0_i32 = arith.constant 0 : i32
    %c0_i32_0 = arith.constant 0 : i32
    return %arg0, %c0_i32 : i32, i32
  }
}

</mosaic_0001>

<bundles_post_ra>
// kernel: _lambda_.1
= control target key start
LH: loop header
LB: loop body
LE: loop exit
PB: predicated region body
PF: predicated region fallthrough
CT: control target
= control target key end

     0   :  { %s1339_s1 = inlined_call_operand.vmem [shape: bf16[768,256], index: 1, kind: input, shape index: {}]   ;;  %s1340_s0 = inlined_call_operand.vmem [shape: bf16[8,768], index: 0, kind: input, shape index: {}]   ;;  %s1341_s2 = inlined_call_operand.vmem [shape: f32[1,256], index: 2, kind: input, shape index: {}]   ;;  %s1342_s3 = inlined_call_operand.vmem [shape: f32[8,256], index: 3, kind: output, shape index: {}]  }
   0x1   :  { %v857_v0 = vld [vmem:[%s1339_s1 + $0x74] ss:$8 sps:$4 sm:$0xff]   ;;  %v859_v1 = vld [vmem:[%s1339_s1 + $0x70] ss:$8 sps:$4 sm:$0xff]   ;;  %v863_v4 = vld [vmem:[%s1339_s1 + $0x64] ss:$8 sps:$4 sm:$0xff]  }
   0x2   :  { %626 = vmatprep.subr.bf16.mxu0 %v857_v0  ;;  %v860_v2 = vld [vmem:[%s1339_s1 + $0x174] ss:$8 sps:$4 sm:$0xff]   ;;  %v862_v3 = vld [vmem:[%s1339_s1 + $0x170] ss:$8 sps:$4 sm:$0xff]   ;;  %v865_v5 = vld [vmem:[%s1339_s1 + $0x60] ss:$8 sps:$4 sm:$0xff]  }
   0x3   :  { %627 = vmatpush1.bf16.msra.mxu0 %v859_v1  ;;  %667 = vmatprep.subr.bf16.mxu1 %v860_v2  ;;  %v866_v6 = vld [vmem:[%s1339_s1 + $0x164] ss:$8 sps:$4 sm:$0xff]   ;;  %v868_v7 = vld [vmem:[%s1339_s1 + $0x160] ss:$8 sps:$4 sm:$0xff]   ;;  %v869_v8 = vld [vmem:[%s1339_s1 + $0x54] ss:$8 sps:$4 sm:$0xff]  }
   0x4   :  { %668 = vmatpush1.bf16.msra.mxu1 %v862_v3  ;;  %628 = vmatprep.subr.bf16.mxu0 %v863_v4  ;;  %v871_v9 = vld [vmem:[%s1339_s1 + $0x50] ss:$8 sps:$4 sm:$0xff]   ;;  %v872_v10 = vld [vmem:[%s1339_s1 + $0x154] ss:$8 sps:$4 sm:$0xff]   ;;  %v875_v11 = vld [vmem:[%s1339_s1 + $0x44] ss:$8 sps:$4 sm:$0xff]  }
   0x5   :  { %669 = vmatprep.subr.bf16.mxu1 %v866_v6  ;;  %v874_v12 = vld [vmem:[%s1339_s1 + $0x150] ss:$8 sps:$4 sm:$0xff]   ;;  %v878_v13 = vld [vmem:[%s1339_s1 + $0x144] ss:$8 sps:$4 sm:$0xff]   ;;  %v877_v14 = vld [vmem:[%s1339_s1 + $0x40] ss:$8 sps:$4 sm:$0xff]  }
   0x6   :  { %v881_v15 = vld [vmem:[%s1339_s1 + $0x34] ss:$8 sps:$4 sm:$0xff]   ;;  %v880_v16 = vld [vmem:[%s1339_s1 + $0x140] ss:$8 sps:$4 sm:$0xff]   ;;  %v883_v18 = vld [vmem:[%s1339_s1 + $0x30] ss:$8 sps:$4 sm:$0xff]  }
   0x7   :  { %629 = vmatpush1.bf16.msra.mxu0 %v865_v5  ;;  %v884_v17 = vld [vmem:[%s1339_s1 + $0x134] ss:$8 sps:$4 sm:$0xff]   ;;  %v887_v19 = vld [vmem:[%s1339_s1 + $0x24] ss:$8 sps:$4 sm:$0xff]   ;;  %v886_v20 = vld [vmem:[%s1339_s1 + $0x130] ss:$8 sps:$4 sm:$0xff]  }
   0x8   :  { %630 = vmatprep.subr.bf16.mxu0 %v869_v8  ;;  %670 = vmatpush1.bf16.msra.mxu1 %v868_v7  ;;  %v890_v21 = vld [vmem:[%s1339_s1 + $0x124] ss:$8 sps:$4 sm:$0xff]   ;;  %v889_v22 = vld [vmem:[%s1339_s1 + $0x20] ss:$8 sps:$4 sm:$0xff]   ;;  %v893_v23 = vld [vmem:[%s1339_s1 + $0x14] ss:$8 sps:$4 sm:$0xff]  }
   0x9   :  { %671 = vmatprep.subr.bf16.mxu1 %v872_v10  ;;  %v892_v24 = vld [vmem:[%s1339_s1 + $0x120] ss:$8 sps:$4 sm:$0xff]   ;;  %v896_v25 = vld [vmem:[%s1339_s1 + $0x114] ss:$8 sps:$4 sm:$0xff]   ;;  %v895_v26 = vld [vmem:[%s1339_s1 + $0x10] ss:$8 sps:$4 sm:$0xff]  }
   0xa   :  { %v899_v27 = vld [vmem:[%s1339_s1 + $0x4] ss:$8 sps:$4 sm:$0xff]   ;;  %v898_v28 = vld [vmem:[%s1339_s1 + $0x110] ss:$8 sps:$4 sm:$0xff]   ;;  %v901_v30 = vld [vmem:[%s1339_s1] ss:$8 sps:$4 sm:$0xff]  }
   0xb   :  { %631 = vmatpush1.bf16.msra.mxu0 %v871_v9  ;;  %v902_v29 = vld [vmem:[%s1339_s1 + $0x104] ss:$8 sps:$4 sm:$0xff]   ;;  %v905_v31 = vld [vmem:[%s1339_s1 + $0xf4] ss:$8 sps:$4 sm:$0xff]   ;;  %v904_v32 = vld [vmem:[%s1339_s1 + $0x100] ss:$8 sps:$4 sm:$0xff]  }
   0xc   :  { %632 = vmatprep.subr.bf16.mxu0 %v875_v11  ;;  %672 = vmatpush1.bf16.msra.mxu1 %v874_v12  ;;  %v908_v33 = vld [vmem:[%s1339_s1 + $0x1f4] ss:$8 sps:$4 sm:$0xff]   ;;  %v907_v34 = vld [vmem:[%s1339_s1 + $0xf0] ss:$8 sps:$4 sm:$0xff]   ;;  %v911_v35 = vld [vmem:[%s1339_s1 + $0xe4] ss:$8 sps:$4 sm:$0xff]  }
   0xd   :  { %673 = vmatprep.subr.bf16.mxu1 %v878_v13  ;;  %v910_v36 = vld [vmem:[%s1339_s1 + $0x1f0] ss:$8 sps:$4 sm:$0xff]   ;;  %v914_v37 = vld [vmem:[%s1339_s1 + $0x1e4] ss:$8 sps:$4 sm:$0xff]   ;;  %v913_v38 = vld [vmem:[%s1339_s1 + $0xe0] ss:$8 sps:$4 sm:$0xff]  }
   0xe   :  { %v917_v39 = vld [vmem:[%s1339_s1 + $0xd4] ss:$8 sps:$4 sm:$0xff]   ;;  %v916_v40 = vld [vmem:[%s1339_s1 + $0x1e0] ss:$8 sps:$4 sm:$0xff]   ;;  %v919_v42 = vld [vmem:[%s1339_s1 + $0xd0] ss:$8 sps:$4 sm:$0xff]  }
   0xf   :  { %633 = vmatpush1.bf16.msra.mxu0 %v877_v14  ;;  %v920_v41 = vld [vmem:[%s1339_s1 + $0x1d4] ss:$8 sps:$4 sm:$0xff]   ;;  %v923_v43 = vld [vmem:[%s1339_s1 + $0xc4] ss:$8 sps:$4 sm:$0xff]   ;;  %v922_v44 = vld [vmem:[%s1339_s1 + $0x1d0] ss:$8 sps:$4 sm:$0xff]  }
  0x10   :  { %634 = vmatprep.subr.bf16.mxu0 %v881_v15  ;;  %674 = vmatpush1.bf16.msra.mxu1 %v880_v16  ;;  %v926_v45 = vld [vmem:[%s1339_s1 + $0x1c4] ss:$8 sps:$4 sm:$0xff]   ;;  %v925_v47 = vld [vmem:[%s1339_s1 + $0xc0] ss:$8 sps:$4 sm:$0xff]   ;;  %v929_v49 = vld [vmem:[%s1339_s1 + $0xb4] ss:$8 sps:$4 sm:$0xff]  }
  0x11   :  { %675 = vmatprep.subr.bf16.mxu1 %v884_v17  ;;  %v14_v46 = vld [vmem:[%s1340_s0] sm:$0xff]  ;;  %v15_v50 = vld [vmem:[%s1340_s0 + $0x8] sm:$0xff]  ;;  %v932_v53 = vld [vmem:[%s1339_s1 + $0x1b4] ss:$8 sps:$4 sm:$0xff]  }
  0x12   :  { %v756_v48 = vcombine.high %v14_v46, %v14_v46  ;;  %v928_v51 = vld [vmem:[%s1339_s1 + $0x1c0] ss:$8 sps:$4 sm:$0xff]   ;;  %v758_v52 = vcombine.high %v15_v50, %v15_v50  ;;  %v931_v54 = vld [vmem:[%s1339_s1 + $0xb0] ss:$8 sps:$4 sm:$0xff]   ;;  %v935_v55 = vld [vmem:[%s1339_s1 + $0xa4] ss:$8 sps:$4 sm:$0xff]   ;;  %v755_v5 = vcombine.low %v14_v46, %v14_v46  ;;  %v757_v7 = vcombine.low %v15_v50, %v15_v50 }
  0x13   :  { %635 = vmatpush1.bf16.msra.mxu0 %v883_v18  ;;  %v934_v56 = vld [vmem:[%s1339_s1 + $0x1b0] ss:$8 sps:$4 sm:$0xff]   ;;  %v938_v57 = vld [vmem:[%s1339_s1 + $0x1a4] ss:$8 sps:$4 sm:$0xff]   ;;  %v937_v58 = vld [vmem:[%s1339_s1 + $0xa0] ss:$8 sps:$4 sm:$0xff]  }
  0x14   :  { %636 = vmatprep.subr.bf16.mxu0 %v887_v19  ;;  %676 = vmatpush1.bf16.msra.mxu1 %v886_v20  ;;  %v941_v59 = vld [vmem:[%s1339_s1 + $0x94] ss:$8 sps:$4 sm:$0xff]   ;;  %v940_v60 = vld [vmem:[%s1339_s1 + $0x1a0] ss:$8 sps:$4 sm:$0xff]   ;;  %v943_v62 = vld [vmem:[%s1339_s1 + $0x90] ss:$8 sps:$4 sm:$0xff]  }
  0x15   :  { %677 = vmatprep.subr.bf16.mxu1 %v890_v21  ;;  %658 = vmatprep.mubr.bf16.mxu0 %v756_v48  ;;  %v944_v61 = vld [vmem:[%s1339_s1 + $0x194] ss:$8 sps:$4 sm:$0xff]   ;;  %v947_v63 = vld [vmem:[%s1339_s1 + $0x84] ss:$8 sps:$4 sm:$0xff]   ;;  %v946_v0 = vld [vmem:[%s1339_s1 + $0x190] ss:$8 sps:$4 sm:$0xff]  }
  0x16   :  { %699 = vmatprep.mubr.bf16.mxu1 %v758_v52  ;;  %v950_v1 = vld [vmem:[%s1339_s1 + $0x184] ss:$8 sps:$4 sm:$0xff]   ;;  %v949_v2 = vld [vmem:[%s1339_s1 + $0x80] ss:$8 sps:$4 sm:$0xff]   ;;  %v957_v3 = vld [vmem:[%s1339_s1 + $0x274] ss:$8 sps:$4 sm:$0xff]  }
  0x17   :  { %637 = vmatpush1.bf16.msra.mxu0 %v889_v22  ;;  %v954_v4 = vld [vmem:[%s1339_s1 + $0x180] ss:$8 sps:$4 sm:$0xff]   ;;  %v955_v6 = vld [vmem:[%s1339_s1 + $0x270] ss:$8 sps:$4 sm:$0xff]   ;;  %v962_v8 = vld [vmem:[%s1339_s1 + $0x264] ss:$8 sps:$4 sm:$0xff]  }
  0x18   :  { %638 = vmatprep.subr.bf16.mxu0 %v893_v23  ;;  %678 = vmatpush1.bf16.msra.mxu1 %v892_v24  ;;  %v1237_v9 = vld [vmem:[%s1340_s0 + $0x10] sm:$0xff]  ;;  %v960_v11 = vld [vmem:[%s1339_s1 + $0x260] ss:$8 sps:$4 sm:$0xff]   ;;  %v968_v14 = vld [vmem:[%s1339_s1 + $0x244] ss:$8 sps:$4 sm:$0xff]  }
  0x19   :  { %679 = vmatprep.subr.bf16.mxu1 %v896_v25  ;;  %v760_v10 = vcombine.high %v1237_v9, %v1237_v9  ;;  %v965_v12 = vld [vmem:[%s1339_s1 + $0x254] ss:$8 sps:$4 sm:$0xff]   ;;  %v963_v13 = vld [vmem:[%s1339_s1 + $0x250] ss:$8 sps:$4 sm:$0xff]   ;;  %v966_v15 = vld [vmem:[%s1339_s1 + $0x240] ss:$8 sps:$4 sm:$0xff]  }
  0x1a   :  { %v971_v16 = vld [vmem:[%s1339_s1 + $0x234] ss:$8 sps:$4 sm:$0xff]   ;;  %v969_v17 = vld [vmem:[%s1339_s1 + $0x230] ss:$8 sps:$4 sm:$0xff]   ;;  %v974_v18 = vld [vmem:[%s1339_s1 + $0x224] ss:$8 sps:$4 sm:$0xff]  }
  0x1b   :  { %639 = vmatpush1.bf16.msra.mxu0 %v895_v26  ;;  %v972_v19 = vld [vmem:[%s1339_s1 + $0x220] ss:$8 sps:$4 sm:$0xff]   ;;  %v977_v20 = vld [vmem:[%s1339_s1 + $0x214] ss:$8 sps:$4 sm:$0xff]   ;;  %v975_v21 = vld [vmem:[%s1339_s1 + $0x210] ss:$8 sps:$4 sm:$0xff]  }
  0x1c   :  { %640 = vmatprep.subr.bf16.mxu0 %v899_v27  ;;  %680 = vmatpush1.bf16.msra.mxu1 %v898_v28  ;;  %v980_v22 = vld [vmem:[%s1339_s1 + $0x204] ss:$8 sps:$4 sm:$0xff]   ;;  %v978_v23 = vld [vmem:[%s1339_s1 + $0x200] ss:$8 sps:$4 sm:$0xff]   ;;  %v983_v24 = vld [vmem:[%s1339_s1 + $0x2f4] ss:$8 sps:$4 sm:$0xff]  }
  0x1d   :  { %681 = vmatprep.subr.bf16.mxu1 %v902_v29  ;;  %v981_v25 = vld [vmem:[%s1339_s1 + $0x2f0] ss:$8 sps:$4 sm:$0xff]   ;;  %v986_v26 = vld [vmem:[%s1339_s1 + $0x2e4] ss:$8 sps:$4 sm:$0xff]   ;;  %v984_v27 = vld [vmem:[%s1339_s1 + $0x2e0] ss:$8 sps:$4 sm:$0xff]  }
  0x1e   :  { %v989_v28 = vld [vmem:[%s1339_s1 + $0x2d4] ss:$8 sps:$4 sm:$0xff]   ;;  %v987_v29 = vld [vmem:[%s1339_s1 + $0x2d0] ss:$8 sps:$4 sm:$0xff]   ;;  %v113_v52 = vld [vmem:[%s1341_s2] sm:$0x3] }
  0x1f   :  { %641 = vmatpush1.bf16.msra.mxu0 %v901_v30  ;;  %v992_v30 = vld [vmem:[%s1339_s1 + $0x2c4] ss:$8 sps:$4 sm:$0xff]  }
  0x20   :  { %642 = vmatprep.subr.bf16.mxu0 %v905_v31  ;;  %682 = vmatpush1.bf16.msra.mxu1 %v904_v32  ;;  %v990_v31 = vld [vmem:[%s1339_s1 + $0x2c0] ss:$8 sps:$4 sm:$0xff]   ;;  %v995_v32 = vld [vmem:[%s1339_s1 + $0x2b4] ss:$8 sps:$4 sm:$0xff]  }
  0x21   :  { %683 = vmatprep.subr.bf16.mxu1 %v908_v33  ;;  %v993_v33 = vld [vmem:[%s1339_s1 + $0x2b0] ss:$8 sps:$4 sm:$0xff]  }
  0x23   :  { %643 = vmatpush2.bf16.msra.mxu0 %v907_v34  ;;  %v998_v34 = vld [vmem:[%s1339_s1 + $0x2a4] ss:$8 sps:$4 sm:$0xff]  }
  0x24   :  { %644 = vmatprep.subr.bf16.mxu0 %v911_v35  ;;  %684 = vmatpush2.bf16.msra.mxu1 %v910_v36  ;;  %v996_v35 = vld [vmem:[%s1339_s1 + $0x2a0] ss:$8 sps:$4 sm:$0xff]   ;;  %v1001_v36 = vld [vmem:[%s1339_s1 + $0x294] ss:$8 sps:$4 sm:$0xff]  }
  0x25   :  { %685 = vmatprep.subr.bf16.mxu1 %v914_v37  ;;  %v999_v37 = vld [vmem:[%s1339_s1 + $0x290] ss:$8 sps:$4 sm:$0xff]  }
  0x27   :  { %645 = vmatpush2.bf16.msra.mxu0 %v913_v38  ;;  %v1004_v38 = vld [vmem:[%s1339_s1 + $0x284] ss:$8 sps:$4 sm:$0xff]  }
  0x28   :  { %646 = vmatprep.subr.bf16.mxu0 %v917_v39  ;;  %686 = vmatpush2.bf16.msra.mxu1 %v916_v40  ;;  %v1002_v39 = vld [vmem:[%s1339_s1 + $0x280] ss:$8 sps:$4 sm:$0xff]   ;;  %v759_v40 = vcombine.low %v1237_v9, %v1237_v9 }
  0x29   :  { %687 = vmatprep.subr.bf16.mxu1 %v920_v41 }
  0x2b   :  { %647 = vmatpush2.bf16.msra.mxu0 %v919_v42 }
  0x2c   :  { %648 = vmatprep.subr.bf16.mxu0 %v923_v43  ;;  %688 = vmatpush2.bf16.msra.mxu1 %v922_v44 }
  0x2d   :  { %689 = vmatprep.subr.bf16.mxu1 %v926_v45 }
  0x2f   :  { %649 = vmatpush2.bf16.msra.mxu0 %v925_v47 }
  0x30   :  { %650 = vmatprep.subr.bf16.mxu0 %v929_v49  ;;  %690 = vmatpush2.bf16.msra.mxu1 %v928_v51  ;;  %v115_v49 = vlaneseq }
  0x31   :  { %691 = vmatprep.subr.bf16.mxu1 %v932_v53 }
  0x32   :  { %v116_v50 = vshrl.u32 %v115_v49, 7 }
  0x33   :  { %651 = vmatpush2.bf16.msra.mxu0 %v931_v54 }
  0x34   :  { %652 = vmatprep.subr.bf16.mxu0 %v935_v55  ;;  %692 = vmatpush2.bf16.msra.mxu1 %v934_v56  ;;  %v117_v51 = vsub.s32 0, %v116_v50  ;;  %v121_v53 = vsub.s32 1, %v116_v50 }
  0x35   :  { %693 = vmatprep.subr.bf16.mxu1 %v938_v57 }
  0x36   :  { %v118_v54 = vrot.slane %v113_v52, %v117_v51  ;;  %v122_v55 = vrot.slane %v113_v52, %v121_v53 }
  0x37   :  { %653 = vmatpush2.bf16.msra.mxu0 %v937_v58 }
  0x38   :  { %654 = vmatprep.subr.bf16.mxu0 %v941_v59  ;;  %694 = vmatpush2.bf16.msra.mxu1 %v940_v60 }
  0x39   :  { %695 = vmatprep.subr.bf16.mxu1 %v944_v61 }
  0x3b   :  { %655 = vmatpush2.bf16.msra.mxu0 %v943_v62 }
  0x3c   :  { %656 = vmatprep.subr.bf16.mxu0 %v947_v63  ;;  %696 = vmatpush2.bf16.msra.mxu1 %v946_v0 }
  0x3d   :  { %697 = vmatprep.subr.bf16.mxu1 %v950_v1 }
  0x3f   :  { %657 = vmatpush2.bf16.msra.mxu0 %v949_v2 }
  0x40   :  { %708 = vmatprep.subr.bf16.mxu0 %v957_v3  ;;  %698 = vmatpush2.bf16.msra.mxu1 %v954_v4 }
  0x42   :  { %659 = vmatmul.mubr.bf16.vlgmr.msra.gmra.mxu0 %v755_v5 }
  0x43   :  { %709 = vmatpush1.bf16.msra.mxu0 %v955_v6  ;;  %740 = vmatprep.mubr.bf16.mxu0 %v760_v10 }
  0x44   :  { %700 = vmatmul.mubr.bf16.vlgmr.msra.gmra.mxu1 %v757_v7  ;;  %710 = vmatprep.subr.bf16.mxu0 %v962_v8 }
  0x47   :  { %711 = vmatpush1.bf16.msra.mxu0 %v960_v11 }
  0x48   :  { %712 = vmatprep.subr.bf16.mxu0 %v965_v12 }
  0x4b   :  { %713 = vmatpush1.bf16.msra.mxu0 %v963_v13 }
  0x4c   :  { %714 = vmatprep.subr.bf16.mxu0 %v968_v14 }
  0x4f   :  { %715 = vmatpush1.bf16.msra.mxu0 %v966_v15 }
  0x50   :  { %716 = vmatprep.subr.bf16.mxu0 %v971_v16 }
  0x53   :  { %717 = vmatpush1.bf16.msra.mxu0 %v969_v17 }
  0x54   :  { %718 = vmatprep.subr.bf16.mxu0 %v974_v18 }
  0x57   :  { %719 = vmatpush1.bf16.msra.mxu0 %v972_v19 }
  0x58   :  { %720 = vmatprep.subr.bf16.mxu0 %v977_v20 }
  0x5b   :  { %721 = vmatpush1.bf16.msra.mxu0 %v975_v21 }
  0x5c   :  { %722 = vmatprep.subr.bf16.mxu0 %v980_v22 }
  0x5f   :  { %723 = vmatpush1.bf16.msra.mxu0 %v978_v23 }
  0x60   :  { %724 = vmatprep.subr.bf16.mxu0 %v983_v24 }
  0x63   :  { %725 = vmatpush2.bf16.msra.mxu0 %v981_v25 }
  0x64   :  { %726 = vmatprep.subr.bf16.mxu0 %v986_v26 }
  0x67   :  { %727 = vmatpush2.bf16.msra.mxu0 %v984_v27 }
  0x68   :  { %728 = vmatprep.subr.bf16.mxu0 %v989_v28 }
  0x6b   :  { %729 = vmatpush2.bf16.msra.mxu0 %v987_v29 }
  0x6c   :  { %730 = vmatprep.subr.bf16.mxu0 %v992_v30 }
  0x6f   :  { %731 = vmatpush2.bf16.msra.mxu0 %v990_v31 }
  0x70   :  { %732 = vmatprep.subr.bf16.mxu0 %v995_v32 }
  0x73   :  { %733 = vmatpush2.bf16.msra.mxu0 %v993_v33 }
  0x74   :  { %734 = vmatprep.subr.bf16.mxu0 %v998_v34 }
  0x77   :  { %735 = vmatpush2.bf16.msra.mxu0 %v996_v35 }
  0x78   :  { %736 = vmatprep.subr.bf16.mxu0 %v1001_v36 }
  0x7b   :  { %737 = vmatpush2.bf16.msra.mxu0 %v999_v37 }
  0x7c   :  { %738 = vmatprep.subr.bf16.mxu0 %v1004_v38 }
  0x7f   :  { %739 = vmatpush2.bf16.msra.mxu0 %v1002_v39 }
  0x82   :  { %741 = vmatmul.mubr.bf16.vlgmr.msra.gmra.mxu0 %v759_v40 }
 0x102   :  { %v660_v41 = vpop.f32.mrf.mxu0 }
 0x103   :  { %v661_v56 = vadd.f32 %v660_v41, %v118_v54 }
 0x104   :  { %v662_v42 = vpop.f32.mrf.mxu0  ;;  %v701_v43 = vpop.f32.mrf.mxu1 }
 0x105   :  { %v663_v57 = vadd.f32 %v662_v42, %v122_v55  ;;  %v702_v58 = vadd.f32 %v701_v43, %v661_v56 }
 0x106   :  { %v664_v44 = vpop.f32.mrf.mxu0  ;;  %v703_v45 = vpop.f32.mrf.mxu1 }
 0x107   :  { %v704_v60 = vadd.f32 %v703_v45, %v663_v57 }
 0x108   :  { %v665_v46 = vpop.f32.mrf.mxu0  ;;  %v705_v47 = vpop.f32.mrf.mxu1 }
 0x10a   :  { %v706_v48 = vpop.f32.mrf.mxu1 }
 0x142   :  { %v742_v59 = vpop.f32.mrf.mxu0 }
 0x143   :  { %v743_v61 = vadd.f32 %v742_v59, %v702_v58 }
 0x144   :  { %v744_v62 = vpop.f32.mrf.mxu0 }
 0x145   :  { %749 = vst [vmem:[%s1342_s3] sm:$0xff] %v743_v61  ;;  %v745_v63 = vadd.f32 %v744_v62, %v704_v60 }
 0x146   :  { %v746_v0 = vpop.f32.mrf.mxu0 }
 0x147   :  { %750 = vst [vmem:[%s1342_s3 + $0x8] sm:$0xff] %v745_v63 }
 0x148   :  { %v747_v1 = vpop.f32.mrf.mxu0 }

</bundles_post_ra>
